<compile_context>
chip_gen: v5e
topology: v5e:2x2
jax: 0.10.0
libtpu: 0.0.40
codegen_flags: <defaults>
</compile_context>

<pallas_src>
import functools

import jax
import jax.numpy as jnp
from jax.experimental import pallas as pl
from jax.experimental.pallas import tpu as pltpu


def gbn_kernel(x_ref, gb_ref, o_ref, *, eps, n_valid, n_pad, group_num, tb):
    # x_ref / o_ref block: (TB, chw_pad)     gb_ref block: (2, G, chw_pad) = [gamma; beta]
    xb = x_ref[...].astype(jnp.float32)                  # single upfront fp32 cast

    # --- Per-group-row statistics (lane reductions -> XLU). ---------------------
    # Padded lanes are zeros: they contribute 0 to the sum and n_pad * mean^2 to the
    # centered sum of squares, which is subtracted back out below (two-pass variance).
    mean = jnp.sum(xb, axis=-1, keepdims=True) * (1.0 / n_valid)          # (TB, 1)
    xc = xb - mean                                       # reused for stats AND apply
    css = jnp.sum(xc * xc, axis=-1, keepdims=True)                         # (TB, 1)
    var = (css - n_pad * (mean * mean)) * (1.0 / (n_valid - 1))            # unbiased

    # 1/(std + eps): EUP approximate reciprocal + one Newton step (per-row only work).
    denom = jnp.sqrt(var) + eps
    inv = pl.reciprocal(denom, approx=True)
    inv = inv * (2.0 - denom * inv)                                        # (TB, 1)

    # --- Per-channel affine from the resident lane-expanded table. --------------
    g = group_num
    if tb % g == 0:
        gamma_rows = gb_ref[0]                            # (G, chw_pad)
        beta_rows = gb_ref[1]
        if tb != g:                                       # block rows cycle groups 0..G-1
            gamma_rows = jnp.tile(gamma_rows, (tb // g, 1))
            beta_rows = jnp.tile(beta_rows, (tb // g, 1))
    else:  # g % tb == 0 (enforced by wrapper): block covers a contiguous run of groups
        start = jax.lax.rem(pl.program_id(0) * tb, g)
        start = pl.multiple_of(start, tb)
        gamma_rows = gb_ref[0, pl.ds(start, tb), :]
        beta_rows = gb_ref[1, pl.ds(start, tb), :]

    # --- Fused normalize + affine: single multiply-add, lane-dense store. -------
    o_ref[...] = (xc * (inv * gamma_rows) + beta_rows).astype(o_ref.dtype)


def _choose_tb(ng, g, row_bytes, target_bytes, min_steps, even_steps):
    """Pick rows-per-block TB: a divisor of ng that keeps blocks sublane-dense
    (TB % 8 == 0 or TB == ng), keeps in-kernel gamma/beta row selection trivial
    (TB % g == 0 or g % TB == 0), and respects the per-chip step-count preference."""
    cands = []
    for d in range(1, ng + 1):
        if ng % d:
            continue
        if not (d % g == 0 or g % d == 0):
            continue
        if not (d % 8 == 0 or d == ng):
            continue
        steps = ng // d
        if steps < min_steps:
            continue
        if even_steps and steps > 1 and steps % 2:
            continue
        cands.append(d)
    if not cands:
        if min_steps > 1 or even_steps:
            return _choose_tb(ng, g, row_bytes, target_bytes, 1, False)
        return ng
    # Prefer blocks that fit the byte budget; among those, the largest.
    return max(cands, key=lambda d: (d * row_bytes <= target_bytes, d))


def group_batchnorm2d_forward(x, gamma, beta, *, group_num=16, eps=1e-10):
    n, c, h, w = x.shape
    g = group_num
    assert c >= g and c % g == 0, "channels must be divisible by group_num"
    cg = c // g
    hw = h * w
    chw = cg * hw
    ng = n * g

    # Lane-dense 2-D operand: (N*G, cg*H*W) — exactly torch's x.view(N, G, -1).
    xg = x.reshape(ng, chw)

    # Pad the lane dim to a multiple of 128 so loads/stores stay unmasked.
    chw_pad = ((chw + 127) // 128) * 128
    n_pad = chw_pad - chw
    if n_pad:
        xg = jnp.pad(xg, ((0, 0), (0, n_pad)))

    # Resident per-group affine table: (2, G, chw_pad) = [gamma ; beta], each channel's
    # value repeated across its H*W lanes. Constant index_map -> fetched once.
    gamma_lane = jnp.repeat(gamma.reshape(g, cg), hw, axis=1)
    beta_lane = jnp.repeat(beta.reshape(g, cg), hw, axis=1)
    gb = jnp.stack([gamma_lane, beta_lane]).astype(jnp.float32)
    if n_pad:
        gb = jnp.pad(gb, ((0, 0), (0, 0), (0, n_pad)))

    # Chip-aware tiling: one big block on single-TC chips, even step count otherwise.
    dk = jax.devices()[0].device_kind.lower()
    single_tc = any(t in dk for t in
                    ("v5e", "v5 lite", "v5lite", "v6e", "v6 lite", "v6lite"))
    target_block_bytes = (8 << 20) if single_tc else (4 << 20)
    vmem_limit = (96 << 20) if single_tc else (48 << 20)

    row_bytes = chw_pad * x.dtype.itemsize
    tb = _choose_tb(ng, g, row_bytes, target_block_bytes,
                    min_steps=1 if single_tc else 2,
                    even_steps=not single_tc)
    grid = (ng // tb,)

    out = pl.pallas_call(
        functools.partial(gbn_kernel, eps=eps, n_valid=chw, n_pad=n_pad,
                          group_num=g, tb=tb),
        out_shape=jax.ShapeDtypeStruct((ng, chw_pad), x.dtype),
        grid_spec=pltpu.PrefetchScalarGridSpec(
            num_scalar_prefetch=0,
            grid=grid,
            in_specs=[
                pl.BlockSpec((tb, chw_pad), lambda i: (i, 0)),
                pl.BlockSpec((2, g, chw_pad), lambda i: (0, 0, 0)),  # VMEM-resident table
            ],
            out_specs=pl.BlockSpec((tb, chw_pad), lambda i: (i, 0)),
        ),
        compiler_params=pltpu.CompilerParams(
            dimension_semantics=("parallel",),
            vmem_limit_bytes=vmem_limit,
        ),
    )(xg, gb)

    if n_pad:
        out = out[:, :chw]
    return out.reshape(n, c, h, w)


def gbn_reference(x, gamma, beta, group_num=16, eps=1e-10):
    """Pure-JAX reference mirroring the PyTorch forward (unbiased std, std+eps)."""
    n, c, h, w = x.shape
    xg = x.reshape(n, group_num, -1).astype(jnp.float32)
    mean = jnp.mean(xg, axis=2, keepdims=True)
    std = jnp.std(xg, axis=2, keepdims=True, ddof=1)      # torch.std is unbiased
    xn = ((xg - mean) / (std + eps)).reshape(n, c, h, w)
    return xn * gamma.reshape(1, c, 1, 1) + beta.reshape(1, c, 1, 1)


if __name__ == "__main__":
    B, C, H, W = 2, 32, 16, 16
    GROUPS = 16          # module default group_num=16 (requires C >= 16)
    EPS = 1e-10

    key = jax.random.PRNGKey(0)
    k_x, k_g = jax.random.split(key)
    x = jax.random.normal(k_x, (B, C, H, W), dtype=jnp.float32)
    gamma = jax.random.normal(k_g, (C, 1, 1), dtype=jnp.float32)   # nn.Parameter(torch.randn)
    beta = jnp.zeros((C, 1, 1), dtype=jnp.float32)                 # nn.Parameter(torch.zeros)

    fwd = jax.jit(functools.partial(group_batchnorm2d_forward,
                                    group_num=GROUPS, eps=EPS))
    out = jax.block_until_ready(fwd(x, gamma, beta))

    ref = jax.block_until_ready(gbn_reference(x, gamma, beta, GROUPS, EPS))
    assert out.shape == (B, C, H, W)
    assert jnp.allclose(out, ref, atol=1e-3, rtol=1e-3), (
        float(jnp.max(jnp.abs(out - ref))))

    print("KERNEL_OK")
</pallas_src>

<mosaic_0001>
module attributes {stable_mosaic.version = 11 : i64} {
  func.func @gbn_kernel(%arg0: i32, %arg1: memref<16x512xf32, #tpu.memory_space<vmem>>, %arg2: memref<2x16x512xf32, #tpu.memory_space<vmem>>, %arg3: memref<16x512xf32, #tpu.memory_space<vmem>>) attributes {dimension_semantics = [#tpu.dimension_semantics<parallel>], iteration_bounds = array<i64: 2>, scalar_prefetch = 0 : i64, scratch_operands = 0 : i64, tpu.core_type = #tpu.core_type<tc>, window_params = [{transform_indices = @transform_0, window_bounds = array<i64: 16, 512>}, {pipeline_mode = #tpu.pipeline_mode<synchronous>, transform_indices = @transform_1, window_bounds = array<i64: 2, 16, 512>}, {transform_indices = @transform_2, window_bounds = array<i64: 16, 512>}]} {
    %c0 = arith.constant 0 : index
    %c0_0 = arith.constant 0 : index
    %0 = vector.load %arg1[%c0, %c0_0] : memref<16x512xf32, #tpu.memory_space<vmem>>, vector<16x512xf32>
    %cst = arith.constant dense<0.000000e+00> : vector<16xf32>
    %1 = vector.multi_reduction <add>, %0, %cst [1] : vector<16x512xf32> to vector<16xf32>
    %2 = vector.shape_cast %1 : vector<16xf32> to vector<16x1xf32>
    %cst_1 = arith.constant 0.001953125 : f32
    %3 = vector.broadcast %cst_1 : f32 to vector<16x1xf32>
    %4 = arith.mulf %2, %3 : vector<16x1xf32>
    %5 = vector.broadcast %4 : vector<16x1xf32> to vector<16x512xf32>
    %6 = arith.subf %0, %5 : vector<16x512xf32>
    %7 = arith.mulf %6, %6 : vector<16x512xf32>
    %cst_2 = arith.constant dense<0.000000e+00> : vector<16xf32>
    %8 = vector.multi_reduction <add>, %7, %cst_2 [1] : vector<16x512xf32> to vector<16xf32>
    %9 = vector.shape_cast %8 : vector<16xf32> to vector<16x1xf32>
    %10 = arith.mulf %4, %4 : vector<16x1xf32>
    %cst_3 = arith.constant 0.000000e+00 : f32
    %11 = vector.broadcast %cst_3 : f32 to vector<16x1xf32>
    %12 = arith.mulf %11, %10 : vector<16x1xf32>
    %13 = arith.subf %9, %12 : vector<16x1xf32>
    %cst_4 = arith.constant 0.00195694715 : f32
    %14 = vector.broadcast %cst_4 : f32 to vector<16x1xf32>
    %15 = arith.mulf %13, %14 : vector<16x1xf32>
    %16 = math.sqrt %15 : vector<16x1xf32>
    %cst_5 = arith.constant 1.000000e-10 : f32
    %17 = vector.broadcast %cst_5 : f32 to vector<16x1xf32>
    %18 = arith.addf %16, %17 : vector<16x1xf32>
    %19 = tpu.reciprocal %18 {approx = true} : vector<16x1xf32> -> vector<16x1xf32>
    %20 = arith.mulf %18, %19 : vector<16x1xf32>
    %cst_6 = arith.constant 2.000000e+00 : f32
    %21 = vector.broadcast %cst_6 : f32 to vector<16x1xf32>
    %22 = arith.subf %21, %20 : vector<16x1xf32>
    %23 = arith.mulf %19, %22 : vector<16x1xf32>
    %c0_7 = arith.constant 0 : index
    %c0_8 = arith.constant 0 : index
    %c0_9 = arith.constant 0 : index
    %24 = vector.load %arg2[%c0_7, %c0_8, %c0_9] : memref<2x16x512xf32, #tpu.memory_space<vmem>>, vector<1x16x512xf32>
    %25 = vector.shape_cast %24 : vector<1x16x512xf32> to vector<16x512xf32>
    %c1 = arith.constant 1 : index
    %c0_10 = arith.constant 0 : index
    %c0_11 = arith.constant 0 : index
    %26 = vector.load %arg2[%c1, %c0_10, %c0_11] : memref<2x16x512xf32, #tpu.memory_space<vmem>>, vector<1x16x512xf32>
    %27 = vector.shape_cast %26 : vector<1x16x512xf32> to vector<16x512xf32>
    %28 = vector.broadcast %23 : vector<16x1xf32> to vector<16x512xf32>
    %29 = arith.mulf %28, %25 : vector<16x512xf32>
    %30 = arith.mulf %6, %29 : vector<16x512xf32>
    %31 = arith.addf %30, %27 : vector<16x512xf32>
    %c0_12 = arith.constant 0 : index
    %c0_13 = arith.constant 0 : index
    %32 = vector.load %arg3[%c0_12, %c0_13] : memref<16x512xf32, #tpu.memory_space<vmem>>, vector<16x512xf32>
    tpu.vector_store %arg3[%c0_12, %c0_13], %31 {strides = array<i32>} : memref<16x512xf32, #tpu.memory_space<vmem>>, vector<16x512xf32>,
    return
  }
  func.func @transform_0(%arg0: i32) -> (i32, i32) {
    %c0_i32 = arith.constant 0 : i32
    %c0_i32_0 = arith.constant 0 : i32
    return %arg0, %c0_i32 : i32, i32
  }
  func.func @transform_1(%arg0: i32) -> (i32, i32, i32) {
    %c0_i32 = arith.constant 0 : i32
    %c0_i32_0 = arith.constant 0 : i32
    %c0_i32_1 = arith.constant 0 : i32
    %c0_i32_2 = arith.constant 0 : i32
    return %c0_i32, %c0_i32_0, %c0_i32_1 : i32, i32, i32
  }
  func.func @transform_2(%arg0: i32) -> (i32, i32) {
    %c0_i32 = arith.constant 0 : i32
    %c0_i32_0 = arith.constant 0 : i32
    return %arg0, %c0_i32 : i32, i32
  }
}

</mosaic_0001>

<bundles_post_ra>
// kernel: group_batchnorm2d_forward.1
= control target key start
LH: loop header
LB: loop body
LE: loop exit
PB: predicated region body
PF: predicated region fallthrough
CT: control target
= control target key end

     0   :  { %s409_s9 = smov 0   ;;  %s531_s0 = inlined_call_operand.vmem [shape: f32[32,512], index: 0, kind: input, shape index: {}]   ;;  %s532_s1 = inlined_call_operand.vmem [shape: f32[2,16,512], index: 1, kind: input, shape index: {}]   ;;  %s533_s2 = inlined_call_operand.vmem [shape: f32[32,512], index: 2, kind: output, shape index: {}]  }
   0x1 LB: > { %s347_s10 = sadd.s32 4294967295, %s392_s9   ;;  %p351_p0 = scmp.ge.s32.totalorder %s392_s9, 1  ;;  %s392_s9 = sphi %s409_s9, %s12_s9  }
   0x2   : > { %p114_p1 = scmp.lt.s32.totalorder %s392_s9, 3 }
   0x4   : > { %p115_p2 = pnand %p351_p0, %p114_p1 }
   0x5   : > { %s352_s11 = sshll.u32 (!%p115_p2), %s347_s10, 1 }
   0x6   : > { %118 = sbr.rel (%p115_p2) target bundleno = 324 (0x144), region = 28  ;;  %p139_p3 = scmp.lt.s32.totalorder (!%p115_p2), %s352_s11, 3 }
   0xb   : > { %s535_s11 = smov (!%p139_p3, %s352_s11), 3 }
   0xc   : > { %s368_s12 = sshll.u32 %s535_s11, 5 }
   0xd   : > { %s143_s15 = scalar_lea.vmem %s531_s0, %s368_s12  ;;  %s490_s6 = scalar_lea.vmem %s533_s2, %s368_s12 }
   0xe   : > { %v152_v0 = vld [vmem:[%s143_s15] sm:$0xff]  ;;  %v153_v1 = vld [vmem:[%s143_s15 + $0x8] sm:$0xff]  ;;  %v154_v2 = vld [vmem:[%s143_s15 + $0x10] sm:$0xff] }
   0xf   : > { %v160_v3 = vadd.f32 %v153_v1, %v152_v0  ;;  %v156_v4 = vld [vmem:[%s143_s15 + $0x20] sm:$0xff]  ;;  %v157_v5 = vld [vmem:[%s143_s15 + $0x28] sm:$0xff]  ;;  %v155_v6 = vld [vmem:[%s143_s15 + $0x18] sm:$0xff] }
  0x10   : > { %v165_v8 = vadd.f32 %v157_v5, %v156_v4  ;;  %v158_v9 = vld [vmem:[%s143_s15 + $0x30] sm:$0xff]  ;;  %v159_v12 = vld [vmem:[%s143_s15 + $0x38] sm:$0xff] }
  0x11   : > { %v161_v7 = vadd.f32 %v160_v3, %v154_v2 }
  0x12   : > { %v166_v11 = vadd.f32 %v165_v8, %v158_v9 }
  0x13   : > { %v162_v10 = vadd.f32 %v161_v7, %v155_v6 }
  0x14   : > { %v167_v13 = vadd.f32 %v166_v11, %v159_v12 }
  0x15   : > { %163 = vadd.xlane.f32.xlu0 %v162_v10  ;;  %v240_v10 = vld [vmem:[%s532_s1] sm:$0xff] }
  0x1d   : > { %168 = vadd.xlane.f32.xlu0 %v167_v13  ;;  %v242_v13 = vld [vmem:[%s532_s1 + $0x10] sm:$0xff] }
  0x88   : > { %v164_v14 = vpop.xlane.xlu0 %163 }
  0x89   : > { %v170_v15 = vmul.f32 0.001953125, %v164_v14  ;;  %v243_v14 = vld [vmem:[%s532_s1 + $0x18] sm:$0xff] }
  0x8b   : > { %v425_v16 = vsub.f32 %v152_v0, %v170_v15  ;;  %v427_v17 = vsub.f32 %v153_v1, %v170_v15  ;;  %v429_v18 = vsub.f32 %v154_v2, %v170_v15  ;;  %v431_v19 = vsub.f32 %v155_v6, %v170_v15 }
  0x8c   : > { %v198_v40 = vmul.f32 %v170_v15, %v170_v15 }
  0x8d   : > { %v180_v20 = vmul.f32 %v425_v16, %v425_v16  ;;  %v181_v21 = vmul.f32 %v427_v17, %v427_v17  ;;  %v182_v22 = vmul.f32 %v429_v18, %v429_v18  ;;  %v183_v26 = vmul.f32 %v431_v19, %v431_v19 }
  0x8e   : > { %v200_v41 = vmul.f32 0.0, %v198_v40 }
  0x8f   : > { %v188_v23 = vadd.f32 %v181_v21, %v180_v20 }
  0x90   : > { %v169_v24 = vpop.xlane.xlu0 %168 }
  0x91   : > { %v171_v25 = vmul.f32 0.001953125, %v169_v24  ;;  %v189_v27 = vadd.f32 %v188_v23, %v182_v22 }
  0x93   : > { %v190_v28 = vadd.f32 %v189_v27, %v183_v26  ;;  %v441_v29 = vsub.f32 %v156_v4, %v171_v25  ;;  %v443_v30 = vsub.f32 %v157_v5, %v171_v25  ;;  %v445_v31 = vsub.f32 %v158_v9, %v171_v25  ;;  %v359_v26 = vld [vmem:[%s532_s1 + $0x48] sm:$0xff]  ;;  %v360_v27 = vld [vmem:[%s532_s1 + $0x50] sm:$0xff] }
  0x94   : > { %v447_v32 = vsub.f32 %v159_v12, %v171_v25  ;;  %v199_v45 = vmul.f32 %v171_v25, %v171_v25  ;;  %v241_v12 = vld [vmem:[%s532_s1 + $0x8] sm:$0xff]  ;;  %v358_v25 = vld [vmem:[%s532_s1 + $0x40] sm:$0xff] }
  0x95   : > { %191 = vadd.xlane.f32.xlu1 %v190_v28  ;;  %v184_v33 = vmul.f32 %v441_v29, %v441_v29  ;;  %v185_v34 = vmul.f32 %v443_v30, %v443_v30  ;;  %v186_v35 = vmul.f32 %v445_v31, %v445_v31  ;;  %v361_v28 = vld [vmem:[%s532_s1 + $0x58] sm:$0xff] }
  0x96   : > { %v187_v37 = vmul.f32 %v447_v32, %v447_v32  ;;  %v201_v46 = vmul.f32 0.0, %v199_v45 }
  0x97   : > { %v193_v36 = vadd.f32 %v185_v34, %v184_v33 }
  0x99   : > { %v194_v38 = vadd.f32 %v193_v36, %v186_v35 }
  0x9b   : > { %v195_v39 = vadd.f32 %v194_v38, %v187_v37 }
  0x9d   : > { %196 = vadd.xlane.f32.xlu1 %v195_v39 }
 0x108   : > { %v192_v42 = vpop.xlane.xlu1 %191 }
 0x109   : > { %v202_v43 = vsub.f32 %v192_v42, %v200_v41  ;;  %v246_v41 = vld [vmem:[%s532_s1 + $0x30] sm:$0xff]  ;;  %v247_v42 = vld [vmem:[%s532_s1 + $0x38] sm:$0xff] }
 0x10b   : > { %v204_v44 = vmul.f32 0.0019569471, %v202_v43 }
 0x10d   : > { %378 = vrsqrt.f32 %v204_v44  ;;  %vm213_vm0 = vcmp.eq.f32.partialorder %v204_v44, inf  ;;  %v216_v60 = vand.u32 2147483648, %v204_v44  ;;  %vm215_vm1 = vcmp.eq.f32.partialorder %v204_v44, 0.0 }
 0x110   : > { %v197_v47 = vpop.xlane.xlu1 %196 }
 0x111   : > { %v203_v48 = vsub.f32 %v197_v47, %v201_v46 }
 0x113   : > { %v379_v49 = vpop.eup %378  ;;  %v205_v50 = vmul.f32 0.0019569471, %v203_v48  ;;  %v362_v48 = vld [vmem:[%s532_s1 + $0x60] sm:$0xff] }
 0x114   : > { %v207_v51 = vmul.f32 %v379_v49, %v204_v44 }
 0x115   : > { %380 = vrsqrt.f32 %v205_v50  ;;  %vm225_vm2 = vcmp.eq.f32.partialorder %v205_v50, inf  ;;  %v228_v4 = vand.u32 2147483648, %v205_v50  ;;  %vm227_vm3 = vcmp.eq.f32.partialorder %v205_v50, 0.0 }
 0x116   : > { %v208_v52 = vmul.f32 %v379_v49, %v207_v51  ;;  %v365_v51 = vld [vmem:[%s532_s1 + $0x78] sm:$0xff] }
 0x118   : > { %v209_v53 = vmul.f32 0.5, %v208_v52 }
 0x11a   : > { %v210_v54 = vsub.f32 1.5, %v209_v53 }
 0x11b   : > { %v381_v55 = vpop.eup %380 }
 0x11c   : > { %v211_v56 = vmul.f32 %v379_v49, %v210_v54  ;;  %v219_v57 = vmul.f32 %v381_v55, %v205_v50  ;;  %v363_v49 = vld [vmem:[%s532_s1 + $0x68] sm:$0xff] }
 0x11e   : > { %v212_v58 = vmul.f32 %v211_v56, %v204_v44  ;;  %v220_v59 = vmul.f32 %v381_v55, %v219_v57 }
 0x120   : > { %v214_v61 = vsel %vm213_vm0, %v204_v44, %v212_v58  ;;  %v221_v62 = vmul.f32 0.5, %v220_v59 }
 0x121   : > { %v217_v63 = vsel %vm215_vm1, %v216_v60, %v214_v61 }
 0x122   : > { %v230_v0 = vadd.f32 1e-10, %v217_v63  ;;  %v222_v1 = vsub.f32 1.5, %v221_v62 }
 0x124   : > { %382 = vrcp.f32 %v230_v0  ;;  %v223_v2 = vmul.f32 %v381_v55, %v222_v1 }
 0x126   : > { %v224_v3 = vmul.f32 %v223_v2, %v205_v50 }
 0x128   : > { %v226_v5 = vsel %vm225_vm2, %v205_v50, %v224_v3  ;;  %v364_v50 = vld [vmem:[%s532_s1 + $0x70] sm:$0xff] }
 0x129   : > { %v229_v6 = vsel %vm227_vm3, %v228_v4, %v226_v5 }
 0x12a   : > { %v383_v7 = vpop.eup %382  ;;  %v231_v8 = vadd.f32 1e-10, %v229_v6 }
 0x12b   : > { %v234_v9 = vmul.f32 %v383_v7, %v230_v0 }
 0x12c   : > { %384 = vrcp.f32 %v231_v8 }
 0x12d   : > { %v236_v11 = vsub.f32 2.0, %v234_v9 }
 0x12f   : > { %v238_v15 = vmul.f32 %v383_v7, %v236_v11 }
 0x131   : > { %v257_v20 = vmul.f32 %v240_v10, %v238_v15  ;;  %v258_v21 = vmul.f32 %v241_v12, %v238_v15  ;;  %v259_v22 = vmul.f32 %v242_v13, %v238_v15  ;;  %v260_v23 = vmul.f32 %v243_v14, %v238_v15 }
 0x132   : > { %v385_v24 = vpop.eup %384 }
 0x133   : > { %v265_v33 = vmul.f32 %v257_v20, %v425_v16  ;;  %v266_v34 = vmul.f32 %v258_v21, %v427_v17  ;;  %v267_v35 = vmul.f32 %v259_v22, %v429_v18  ;;  %v268_v36 = vmul.f32 %v260_v23, %v431_v19  ;;  %v244_v17 = vld [vmem:[%s532_s1 + $0x20] sm:$0xff]  ;;  %v245_v19 = vld [vmem:[%s532_s1 + $0x28] sm:$0xff] }
 0x134   : > { %v235_v37 = vmul.f32 %v385_v24, %v231_v8 }
 0x135   : > { %v273_v38 = vadd.f32 %v358_v25, %v265_v33  ;;  %v274_v39 = vadd.f32 %v359_v26, %v266_v34  ;;  %v275_v16 = vadd.f32 %v360_v27, %v267_v35  ;;  %v276_v40 = vadd.f32 %v361_v28, %v268_v36 }
 0x136   : > { %v237_v18 = vsub.f32 2.0, %v235_v37 }
 0x137   : > { %281 = vst [vmem:[%s490_s6] sm:$0xff] %v273_v38 }
 0x138   : > { %282 = vst [vmem:[%s490_s6 + $0x8] sm:$0xff] %v274_v39  ;;  %v239_v43 = vmul.f32 %v385_v24, %v237_v18 }
 0x139   : > { %283 = vst [vmem:[%s490_s6 + $0x10] sm:$0xff] %v275_v16 }
 0x13a   : > { %284 = vst [vmem:[%s490_s6 + $0x18] sm:$0xff] %v276_v40  ;;  %v261_v44 = vmul.f32 %v244_v17, %v239_v43  ;;  %v262_v45 = vmul.f32 %v245_v19, %v239_v43  ;;  %v263_v46 = vmul.f32 %v246_v41, %v239_v43  ;;  %v264_v47 = vmul.f32 %v247_v42, %v239_v43 }
 0x13c   : > { %v269_v52 = vmul.f32 %v261_v44, %v441_v29  ;;  %v270_v53 = vmul.f32 %v262_v45, %v443_v30  ;;  %v271_v54 = vmul.f32 %v263_v46, %v445_v31  ;;  %v272_v55 = vmul.f32 %v264_v47, %v447_v32 }
 0x13e   : > { %v277_v56 = vadd.f32 %v362_v48, %v269_v52  ;;  %v278_v57 = vadd.f32 %v363_v49, %v270_v53  ;;  %v279_v58 = vadd.f32 %v364_v50, %v271_v54  ;;  %v280_v59 = vadd.f32 %v365_v51, %v272_v55 }
 0x140   : > { %285 = vst [vmem:[%s490_s6 + $0x20] sm:$0xff] %v277_v56 }
 0x141   : > { %286 = vst [vmem:[%s490_s6 + $0x28] sm:$0xff] %v278_v57 }
 0x142   : > { %287 = vst [vmem:[%s490_s6 + $0x30] sm:$0xff] %v279_v58 }
 0x143   : > { %288 = vst [vmem:[%s490_s6 + $0x38] sm:$0xff] %v280_v59 }
 0x144 PF: > { %s12_s9 = sadd.s32 1, %s392_s9  }
 0x145   : > { %p9_p4 = scmp.ge.s32.totalorder %s12_s9, 4  }
 0x147   :  { %11 = sbr.rel (!%p9_p4) target bundleno = 1 (0x1), region = 59 }

</bundles_post_ra>
